<compile_context>
chip_gen: v6e
topology: v6e:2x2x1
jax: 0.10.0
libtpu: 0.0.40
codegen_flags: <defaults>
</compile_context>

<pallas_src>
import math
import functools

import jax
import jax.numpy as jnp
from jax.experimental import pallas as pl
from jax.experimental.pallas import tpu as pltpu

COULOMB_FACTOR = 14.399645478425668
ENERGY_SCALE = 1.0
SCF = COULOMB_FACTOR / ENERGY_SCALE          # scaled_coulomb_factor
SQRT2 = math.sqrt(2.0)
INV_SQRT2 = 1.0 / SQRT2
SQRT_PI = math.sqrt(math.pi)
EPS = 1e-6                                   # torch.pairwise_distance eps

VMEM_LIMIT = 48 * 1024 * 1024                # < 64 MiB physical VMEM of v7x


def _pick_tile(n, cap):
    """Largest tile <= cap that divides n (multiple of 8), else n itself (full dim)."""
    for t in (cap, 512, 256, 128, 64, 32, 16, 8):
        if t <= cap and t <= n and n % t == 0:
            return t
    return n


# ----------------------------------------------------------------------------
# Kernel 1: per-atom quantities
#   chi_i  = Linear(node_features)_i          (exact f32 VPU multiply + reduce)
#   diag_i = hardness_i^2 + SCF/(sqrt(pi)*sigma_i)   (Qeq diagonal, reused twice)
# ----------------------------------------------------------------------------
def atomwise_kernel(feats_ref, w_ref, sig_ref, hard_ref, chi_ref, diag_ref):
    chi_ref[...] = jnp.sum(feats_ref[...] * w_ref[...], axis=1, keepdims=True)
    sig = sig_ref[...]
    hard = hard_ref[...]
    diag_ref[...] = hard * hard + SCF / (SQRT_PI * sig)


# ----------------------------------------------------------------------------
# Kernel 2: per-graph Qeq coefficient blocks (pairwise erf/Coulomb + diagonal)
#   grid = (B, N//T, N//T); each step writes one (T, T) tile of graph b.
# ----------------------------------------------------------------------------
def coeffs_kernel(pos_ref, posT_ref, sig_ref, sigT_ref, diag_ref, out_ref, *, T):
    ti = pl.program_id(1)
    tj = pl.program_id(2)
    # local (within-graph) atom indices of this tile
    row_l = ti * T + jax.lax.broadcasted_iota(jnp.int32, (T, T), 0)
    col_l = tj * T + jax.lax.broadcasted_iota(jnp.int32, (T, T), 1)

    pos_i = pos_ref[...]            # (T, 3)   row-side atoms
    pos_j = posT_ref[0]             # (3, T)   col-side atoms (pre-transposed tile)
    sig_i = sig_ref[...]            # (T, 1)
    sig_j = sigT_ref[0]             # (1, T)

    # PyTorch fills the strict upper triangle with
    # pairwise_distance(pos[i], pos[j]) = ||pos_i - pos_j + eps|| (i < j) and
    # mirrors it; reproduce the "+eps" direction exactly with a sign flip.
    sgn = jnp.where(col_l > row_l, 1.0, -1.0)
    dx = (pos_i[:, 0:1] - pos_j[0:1, :]) * sgn + EPS
    dy = (pos_i[:, 1:2] - pos_j[1:2, :]) * sgn + EPS
    dz = (pos_i[:, 2:3] - pos_j[2:3, :]) * sgn + EPS
    dist = jnp.sqrt(dx * dx + dy * dy + dz * dz)

    inv_gamma = jax.lax.rsqrt(sig_i * sig_i + sig_j * sig_j)       # EUP rsqrt
    # keep the exact division by dist (eps-regularized diagonal is tiny)
    off = SCF * jax.lax.erf(dist * inv_gamma * INV_SQRT2) / dist

    # single fused select: diagonal value on row==col, erf/Coulomb term elsewhere
    out_ref[0, :, :] = jnp.where(row_l == col_l, diag_ref[...], off)


# ----------------------------------------------------------------------------
# Kernel 3: per-atom Qeq energy contributions
#   pair term uses the MXU: masked (T, N) @ (N, 1) matvec (upper triangle only);
#   HIGHEST precision keeps exact f32 at negligible cost (MXU is otherwise idle
#   and the matvec is tiny next to the coeffs kernel).
# ----------------------------------------------------------------------------
def energy_kernel(cb_ref, chi_ref, qi_ref, qg_ref, diag_ref, e_ref, *, T):
    ti = pl.program_id(1)
    n_graph = cb_ref.shape[2]
    row_l = ti * T + jax.lax.broadcasted_iota(jnp.int32, (T, n_graph), 0)
    col_l = jax.lax.broadcasted_iota(jnp.int32, (T, n_graph), 1)

    masked = jnp.where(col_l > row_l, cb_ref[0], 0.0)              # (T, N)
    pair_rows = jnp.dot(masked, qg_ref[...],
                        preferred_element_type=jnp.float32,
                        precision=jax.lax.Precision.HIGHEST)       # (T, 1)
    q = qi_ref[...]                                                # (T, 1)
    e_ref[...] = q * pair_rows + chi_ref[...] * q + 0.5 * diag_ref[...] * q * q


# ----------------------------------------------------------------------------
# Glue: per-graph bordered linear solve for the charges.
# ----------------------------------------------------------------------------
def solve_charges(coeff_blocks, chi, total_charge, B, N):
    # TODO(synk): torch.linalg.solve on the bordered (N+1)x(N+1) system has no
    # clean Pallas equivalent (pivoted dense solve); kept in plain JAX.
    M = jnp.ones((B, N + 1, N + 1), coeff_blocks.dtype)
    M = M.at[:, :N, :N].set(coeff_blocks)
    M = M.at[:, N, N].set(0.0)
    rhs = jnp.concatenate([-chi.reshape(B, N, 1),
                           total_charge.reshape(B, 1, 1)], axis=1)
    sol = jnp.linalg.solve(M, rhs)                                 # (B, N+1, 1)
    return sol[:, :N, :].reshape(B * N, 1)                         # (A, 1)


# ----------------------------------------------------------------------------
# Wrapper: full Qeq forward
# ----------------------------------------------------------------------------
def qeq_forward(pos, feats, species_idx, total_charge,
                W, sigma_tab, hardness_params, B, N):
    A, F = feats.shape
    assert A == B * N, "atoms must be contiguous equal-size graph blocks"
    assert N % 8 == 0, "per-graph atom count must be a multiple of 8 (TPU sublane)"

    f32 = jnp.float32
    pos = pos.astype(f32)
    feats = feats.astype(f32)
    sig = sigma_tab[species_idx].astype(f32)            # (A,) gather (glue)
    hard = hardness_params[species_idx].astype(f32)     # (A,) gather (glue)
    sig_col = sig[:, None]                              # (A, 1)

    # ---- kernel 1: chi + Qeq diagonal, tiled over atoms, one pass ----
    TA = _pick_tile(A, 512)
    chi, diag = pl.pallas_call(
        atomwise_kernel,
        out_shape=(jax.ShapeDtypeStruct((A, 1), f32),
                   jax.ShapeDtypeStruct((A, 1), f32)),
        grid=(A // TA,),
        in_specs=[pl.BlockSpec((TA, F), lambda i: (i, 0)),
                  pl.BlockSpec((1, F), lambda i: (0, 0)),
                  pl.BlockSpec((TA, 1), lambda i: (i, 0)),
                  pl.BlockSpec((TA, 1), lambda i: (i, 0))],
        out_specs=[pl.BlockSpec((TA, 1), lambda i: (i, 0)),
                   pl.BlockSpec((TA, 1), lambda i: (i, 0))],
        compiler_params=pltpu.CompilerParams(dimension_semantics=("parallel",)),
    )(feats, W.reshape(1, F), sig_col, hard[:, None])

    # ---- kernel 2: block-diagonal coefficient blocks, tiled (b, ti, tj) ----
    T = _pick_tile(N, 256)
    nI = N // T
    # lane-dense "column-side" tiles built by cheap wrapper-side layout plumbing
    posT_tiles = pos.reshape(B * nI, T, 3).transpose(0, 2, 1)      # (B*nI, 3, T)
    sigT_tiles = sig.reshape(B * nI, 1, T)                         # (B*nI, 1, T)

    row_map = lambda b, ti, tj: (b * nI + ti, 0)
    jtile_map = lambda b, ti, tj: (b * nI + tj, 0, 0)

    coeff_blocks = pl.pallas_call(
        functools.partial(coeffs_kernel, T=T),
        out_shape=jax.ShapeDtypeStruct((B, N, N), f32),
        grid=(B, nI, nI),
        in_specs=[pl.BlockSpec((T, 3), row_map),
                  pl.BlockSpec((1, 3, T), jtile_map),
                  pl.BlockSpec((T, 1), row_map),
                  pl.BlockSpec((1, 1, T), jtile_map),
                  pl.BlockSpec((T, 1), row_map)],
        out_specs=pl.BlockSpec((1, T, T), lambda b, ti, tj: (b, ti, tj)),
        compiler_params=pltpu.CompilerParams(
            dimension_semantics=("parallel", "parallel", "parallel"),
            vmem_limit_bytes=VMEM_LIMIT),
    )(pos, posT_tiles, sig_col, sigT_tiles, diag)

    # ---- charges: per-graph bordered solve (plain JAX glue) ----
    charges = solve_charges(coeff_blocks, chi, total_charge, B, N)   # (A, 1)

    # ---- kernel 3: per-atom energy contributions, tiled (b, ti) ----
    e_atom = pl.pallas_call(
        functools.partial(energy_kernel, T=T),
        out_shape=jax.ShapeDtypeStruct((A, 1), f32),
        grid=(B, nI),
        in_specs=[pl.BlockSpec((1, T, N), lambda b, ti: (b, ti, 0)),
                  pl.BlockSpec((T, 1), lambda b, ti: (b * nI + ti, 0)),
                  pl.BlockSpec((T, 1), lambda b, ti: (b * nI + ti, 0)),
                  pl.BlockSpec((N, 1), lambda b, ti: (b, 0)),
                  pl.BlockSpec((T, 1), lambda b, ti: (b * nI + ti, 0))],
        out_specs=pl.BlockSpec((T, 1), lambda b, ti: (b * nI + ti, 0)),
        compiler_params=pltpu.CompilerParams(
            dimension_semantics=("parallel", "parallel"),
            vmem_limit_bytes=VMEM_LIMIT),
    )(coeff_blocks, chi, charges, charges, diag)

    # graphs are contiguous N-atom blocks: per-graph reduction is a trivial
    # reshape + sum of B*N scalars (replaces the one-hot HIGHEST matmul).
    e_qeq = jnp.sum(e_atom.reshape(B, N), axis=1, keepdims=True)     # (B, 1)

    return chi, coeff_blocks, charges, e_qeq


# ----------------------------------------------------------------------------
# Pure-JAX reference (mirrors the PyTorch forward)
# ----------------------------------------------------------------------------
def reference_forward(pos, feats, species_idx, batch_ids, total_charge,
                      W, sigma_tab, hardness_params, B, N):
    A = pos.shape[0]
    chi = jnp.dot(feats, W, precision=jax.lax.Precision.HIGHEST)
    sig = sigma_tab[species_idx]
    hard = hardness_params[species_idx] ** 2
    row = jnp.arange(A)[:, None]
    col = jnp.arange(A)[None, :]
    same = batch_ids[:, None] == batch_ids[None, :]
    upper = same & (col > row)
    diff = pos[:, None, :] - pos[None, :, :] + EPS
    dist = jnp.sqrt(jnp.sum(diff * diff, axis=-1))
    gamma = jnp.sqrt(sig[:, None] ** 2 + sig[None, :] ** 2)
    off = SCF * jax.scipy.special.erf(dist / (SQRT2 * gamma)) / dist
    v = jnp.where(upper, off, 0.0)
    coeffs = v + v.T + jnp.diag(hard + SCF / (SQRT_PI * sig))
    blocks = coeffs.reshape(B, N, B, N)[jnp.arange(B), :, jnp.arange(B), :]
    charges = solve_charges(blocks, chi, total_charge, B, N)
    q = charges[:, 0]
    pair_e = jnp.where(upper, coeffs, 0.0) * q[:, None] * q[None, :]
    onehot = (batch_ids[None, :] == jnp.arange(B)[:, None]).astype(jnp.float32)
    e = onehot @ jnp.sum(pair_e, axis=1) + onehot @ (chi[:, 0] * q + 0.5 * jnp.diag(coeffs) * q * q)
    return chi, coeffs, charges, e[:, None]


if __name__ == "__main__":
    B, N, F = 2, 8, 32            # 2 graphs x 8 atoms, 32-dim node features
    A = B * N
    num_species = 3               # allowed_species = [H, C, O]

    key = jax.random.PRNGKey(0)
    kpos, kfeat, kspec, kw = jax.random.split(key, 4)
    pos = jax.random.uniform(kpos, (A, 3), jnp.float32, minval=0.0, maxval=4.0)
    feats = jax.random.normal(kfeat, (A, F), jnp.float32)
    species_idx = jax.random.randint(kspec, (A,), 0, num_species)
    batch_ids = jnp.repeat(jnp.arange(B, dtype=jnp.int32), N)
    total_charge = jnp.array([0.0, -1.0], jnp.float32)

    # deterministic "module" parameters
    W = jax.random.normal(kw, (F, 1), jnp.float32) / jnp.sqrt(F)        # to_chi weight
    sigma_tab = jnp.array([0.31, 0.76, 0.66], jnp.float32)              # covalent radii H, C, O
    hardness_params = jnp.array([1.0, 0.9, 1.1], jnp.float32)           # to_hardness

    chi, coeff_blocks, charges, e_qeq = qeq_forward(
        pos, feats, species_idx, total_charge,
        W, sigma_tab, hardness_params, B, N)
    jax.block_until_ready((chi, coeff_blocks, charges, e_qeq))

    chi_r, coeffs_r, charges_r, e_r = reference_forward(
        pos, feats, species_idx, batch_ids, total_charge,
        W, sigma_tab, hardness_params, B, N)

    # assemble the full (A, A) matrix from the diagonal blocks for comparison
    # (cross-graph entries are exactly zero by construction).
    coeffs_full = jnp.zeros((B, N, B, N), jnp.float32)
    coeffs_full = coeffs_full.at[jnp.arange(B), :, jnp.arange(B), :].set(coeff_blocks)
    coeffs_full = coeffs_full.reshape(A, A)

    assert chi.shape == (A, 1) and coeff_blocks.shape == (B, N, N)
    assert charges.shape == (A, 1) and e_qeq.shape == (B, 1)
    assert bool(jnp.allclose(chi, chi_r, rtol=1e-3, atol=1e-3)), "chi mismatch"
    assert bool(jnp.allclose(coeffs_full, coeffs_r, rtol=5e-4, atol=5e-4)), "coeffs mismatch"
    assert bool(jnp.allclose(charges, charges_r, rtol=1e-2, atol=1e-2)), "charges mismatch"
    assert bool(jnp.allclose(e_qeq, e_r, rtol=1e-2, atol=1e-2)), "energy mismatch"

    print("KERNEL_OK")
</pallas_src>

<mosaic_0001>
module attributes {stable_mosaic.version = 11 : i64} {
  func.func @atomwise_kernel(%arg0: i32, %arg1: memref<16x32xf32, #tpu.memory_space<vmem>>, %arg2: memref<1x32xf32, #tpu.memory_space<vmem>>, %arg3: memref<16x1xf32, #tpu.memory_space<vmem>>, %arg4: memref<16x1xf32, #tpu.memory_space<vmem>>, %arg5: memref<16x1xf32, #tpu.memory_space<vmem>>, %arg6: memref<16x1xf32, #tpu.memory_space<vmem>>) attributes {dimension_semantics = [#tpu.dimension_semantics<parallel>], iteration_bounds = array<i64: 1>, scalar_prefetch = 0 : i64, scratch_operands = 0 : i64, tpu.core_type = #tpu.core_type<tc>, window_params = [{transform_indices = @transform_0, window_bounds = array<i64: 16, 32>}, {pipeline_mode = #tpu.pipeline_mode<synchronous>, transform_indices = @transform_1, window_bounds = array<i64: 1, 32>}, {transform_indices = @transform_2, window_bounds = array<i64: 16, 1>}, {transform_indices = @transform_3, window_bounds = array<i64: 16, 1>}, {transform_indices = @transform_4, window_bounds = array<i64: 16, 1>}, {transform_indices = @transform_5, window_bounds = array<i64: 16, 1>}]} {
    %c0 = arith.constant 0 : index
    %c0_0 = arith.constant 0 : index
    %0 = vector.load %arg1[%c0, %c0_0] : memref<16x32xf32, #tpu.memory_space<vmem>>, vector<16x32xf32>
    %c0_1 = arith.constant 0 : index
    %c0_2 = arith.constant 0 : index
    %1 = vector.load %arg2[%c0_1, %c0_2] : memref<1x32xf32, #tpu.memory_space<vmem>>, vector<1x32xf32>
    %2 = vector.broadcast %1 : vector<1x32xf32> to vector<16x32xf32>
    %3 = arith.mulf %0, %2 : vector<16x32xf32>
    %cst = arith.constant dense<0.000000e+00> : vector<16xf32>
    %4 = vector.multi_reduction <add>, %3, %cst [1] : vector<16x32xf32> to vector<16xf32>
    %5 = vector.shape_cast %4 : vector<16xf32> to vector<16x1xf32>
    %c0_3 = arith.constant 0 : index
    %c0_4 = arith.constant 0 : index
    %6 = vector.load %arg5[%c0_3, %c0_4] : memref<16x1xf32, #tpu.memory_space<vmem>>, vector<16x1xf32>
    tpu.vector_store %arg5[%c0_3, %c0_4], %5 {strides = array<i32>} : memref<16x1xf32, #tpu.memory_space<vmem>>, vector<16x1xf32>,
    %c0_5 = arith.constant 0 : index
    %c0_6 = arith.constant 0 : index
    %7 = vector.load %arg3[%c0_5, %c0_6] : memref<16x1xf32, #tpu.memory_space<vmem>>, vector<16x1xf32>
    %c0_7 = arith.constant 0 : index
    %c0_8 = arith.constant 0 : index
    %8 = vector.load %arg4[%c0_7, %c0_8] : memref<16x1xf32, #tpu.memory_space<vmem>>, vector<16x1xf32>
    %9 = arith.mulf %8, %8 : vector<16x1xf32>
    %cst_9 = arith.constant 1.7724539 : f32
    %10 = vector.broadcast %cst_9 : f32 to vector<16x1xf32>
    %11 = arith.mulf %10, %7 : vector<16x1xf32>
    %cst_10 = arith.constant 14.3996458 : f32
    %12 = vector.broadcast %cst_10 : f32 to vector<16x1xf32>
    %13 = arith.divf %12, %11 : vector<16x1xf32>
    %14 = arith.addf %9, %13 : vector<16x1xf32>
    %c0_11 = arith.constant 0 : index
    %c0_12 = arith.constant 0 : index
    %15 = vector.load %arg6[%c0_11, %c0_12] : memref<16x1xf32, #tpu.memory_space<vmem>>, vector<16x1xf32>
    tpu.vector_store %arg6[%c0_11, %c0_12], %14 {strides = array<i32>} : memref<16x1xf32, #tpu.memory_space<vmem>>, vector<16x1xf32>,
    return
  }
  func.func @transform_0(%arg0: i32) -> (i32, i32) {
    %c0_i32 = arith.constant 0 : i32
    %c0_i32_0 = arith.constant 0 : i32
    return %arg0, %c0_i32 : i32, i32
  }
  func.func @transform_1(%arg0: i32) -> (i32, i32) {
    %c0_i32 = arith.constant 0 : i32
    %c0_i32_0 = arith.constant 0 : i32
    %c0_i32_1 = arith.constant 0 : i32
    return %c0_i32, %c0_i32_0 : i32, i32
  }
  func.func @transform_2(%arg0: i32) -> (i32, i32) {
    %c0_i32 = arith.constant 0 : i32
    %c0_i32_0 = arith.constant 0 : i32
    return %arg0, %c0_i32 : i32, i32
  }
  func.func @transform_3(%arg0: i32) -> (i32, i32) {
    %c0_i32 = arith.constant 0 : i32
    %c0_i32_0 = arith.constant 0 : i32
    return %arg0, %c0_i32 : i32, i32
  }
  func.func @transform_4(%arg0: i32) -> (i32, i32) {
    %c0_i32 = arith.constant 0 : i32
    %c0_i32_0 = arith.constant 0 : i32
    return %arg0, %c0_i32 : i32, i32
  }
  func.func @transform_5(%arg0: i32) -> (i32, i32) {
    %c0_i32 = arith.constant 0 : i32
    %c0_i32_0 = arith.constant 0 : i32
    return %arg0, %c0_i32 : i32, i32
  }
}

</mosaic_0001>

<bundles_post_ra>
// kernel: tpu_custom_call.1
= control target key start
LH: loop header
LB: loop body
LE: loop exit
PB: predicated region body
PF: predicated region fallthrough
CT: control target
= control target key end

     0   :  { %vm30_vm0 = vcmask 261120   ;;  %vm37_vm1 = vcmask 7168   ;;  %s132_s0 = inlined_call_operand.vmem [shape: f32[16,32], index: 0, kind: input, shape index: {}]   ;;  %s133_s1 = inlined_call_operand.vmem [shape: f32[1,32], index: 1, kind: input, shape index: {}]   ;;  %s134_s2 = inlined_call_operand.vmem [shape: f32[16,1], index: 2, kind: input, shape index: {}]   ;;  %s135_s3 = inlined_call_operand.vmem [shape: f32[16,1], index: 3, kind: input, shape index: {}]   ;;  %s136_s5 = inlined_call_operand.vmem [shape: f32[16,1], index: 5, kind: output, shape index: {1}]   ;;  %s137_s4 = inlined_call_operand.vmem [shape: f32[16,1], index: 4, kind: output, shape index: {0}]  }
   0x1   :  { %v19_v0 = vld [vmem:[%s132_s0] sm:$0xff]  ;;  %v20_v2 = vld [vmem:[%s132_s0 + $0x8] sm:$0xff] }
   0x2   :  { %v64_v1 = vld [vmem:[%s133_s1] ss:$0 sm:$0xff]  ;;  %v41_v6 = vld [vmem:[%s134_s2 + $0x8] sm:$0xff] }
   0x3   :  { %v28_v3 = vmul.f32 %v64_v1, %v19_v0  ;;  %v29_v4 = vmul.f32 %v64_v1, %v20_v2  ;;  %v40_v5 = vld [vmem:[%s134_s2] sm:$0xff]  ;;  %v47_v8 = vmul.f32 1.7724539, %v41_v6  ;;  %v43_v12 = vld [vmem:[%s135_s3 + $0x8] sm:$0xff] }
   0x4   :  { %v46_v7 = vmul.f32 1.7724539, %v40_v5  ;;  %v42_v11 = vld [vmem:[%s135_s3] sm:$0xff]  ;;  %v45_v15 = vmul.f32 %v43_v12, %v43_v12 }
   0x5   :  { %v31_v9 = vsel %vm30_vm0, %v28_v3, 0.0  ;;  %v34_v10 = vsel %vm30_vm0, %v29_v4, 0.0  ;;  %v44_v13 = vmul.f32 %v42_v11, %v42_v11 }
   0x6   :  { %32 = vadd.xlane.f32.xlu0 %v31_v9  ;;  %65 = vrcp.f32 %v46_v7 }
   0x7   :  { %67 = vrcp.f32 %v47_v8 }
   0xa   :  { %35 = vadd.xlane.f32.xlu0 %v34_v10 }
  0x13   :  { %v66_v14 = vpop.eup %65 }
  0x14   :  { %v68_v16 = vpop.eup %67  ;;  %v49_v17 = vmul.f32 14.399646, %v66_v14 }
  0x15   :  { %v51_v18 = vmul.f32 14.399646, %v68_v16 }
  0x16   :  { %v52_v19 = vadd.f32 %v49_v17, %v44_v13 }
  0x17   :  { %v53_v20 = vadd.f32 %v51_v18, %v45_v15 }
  0x18   :  { %54 = vst.msk [vmem:[%s136_s5] sm:$0xff] %vm37_vm1, %v52_v19 }
  0x19   :  { %55 = vst.msk [vmem:[%s136_s5 + $0x8] sm:$0xff] %vm37_vm1, %v53_v20 }
  0x8f   :  { %v33_v21 = vpop.xlane.xlu0 %32 }
  0x90   :  { %38 = vst.msk [vmem:[%s137_s4] sm:$0xff] %vm37_vm1, %v33_v21 }
  0x93   :  { %v36_v22 = vpop.xlane.xlu0 %35 }
  0x94   :  { %39 = vst.msk [vmem:[%s137_s4 + $0x8] sm:$0xff] %vm37_vm1, %v36_v22 }

</bundles_post_ra>
